<compile_context>
chip_gen: v7x
topology: tpu7x:2x2x1
jax: 0.10.0
libtpu: 0.0.40
codegen_flags: <defaults>
</compile_context>

<pallas_src>
import jax
import jax.numpy as jnp
from jax import lax
from jax.experimental import pallas as pl
from jax.experimental.pallas import tpu as pltpu

# Hyperparameters implied by the module's __init__ / forward.
N_EMBED = 32
BLOCK_SIZE = 8      # max sequence length (size of the registered tril buffer)
HEAD_SIZE = 16
DROPOUT = 0.1       # inactive at inference

_NEG_BIG = -1e30    # plain Python float (NOT a jnp array -> no captured const)


def attention_head_kernel(x_ref, wqkv_ref, o_ref):
    # x_ref:    (B, T, C)  whole batch
    # wqkv_ref: (C, 3H)    [q | k | v] pre-transposed; q block pre-scaled by C**-0.5
    # o_ref:    (B, T, H)
    x = x_ref[...]                      # (B, T, C)
    wqkv = wqkv_ref[...]                # (C, 3H)
    B, T, C = x.shape
    H = o_ref.shape[-1]

    # Fused projection: one MXU matmul for q, k, v.
    x2 = x.reshape(B * T, C)
    qkv = jnp.dot(x2, wqkv, preferred_element_type=jnp.float32)    # (B*T, 3H)
    qkv = qkv.reshape(B, T, 3 * H)
    q = qkv[:, :, 0 * H:1 * H]
    k = qkv[:, :, 1 * H:2 * H]
    v = qkv[:, :, 2 * H:3 * H]

    # Attention scores (C**-0.5 scale already folded into the query weights).
    # Contraction over the last dim of both operands -> no in-kernel transpose.
    wei = jnp.einsum('bqh,bkh->bqk', q, k,
                     preferred_element_type=jnp.float32)           # (B, T, T)

    # Causal mask built in-kernel (VPU iota + compare; no tril input).
    rows = lax.broadcasted_iota(jnp.int32, (T, T), 0)
    cols = lax.broadcasted_iota(jnp.int32, (T, T), 1)
    wei = jnp.where(rows >= cols, wei, _NEG_BIG)

    # Numerically-stable softmax (f32).
    m = jnp.max(wei, axis=-1, keepdims=True)
    e = jnp.exp(wei - m)
    wei = e / jnp.sum(e, axis=-1, keepdims=True)

    # Dropout is identity in inference mode.

    # Weighted sum of values: (B, T, T) @ (B, T, H) -> (B, T, H)
    out = jnp.einsum('bqk,bkh->bqh', wei, v,
                     preferred_element_type=jnp.float32)
    o_ref[...] = out.astype(o_ref.dtype)


def attention_head(x, w_key, w_query, w_value):
    """x: (B, T, C); w_*: (H, C) in PyTorch nn.Linear layout. Returns (B, T, H)."""
    B, T, C = x.shape
    H = w_key.shape[0]

    # Host-side, one-time: fuse + pre-transpose weights -> (C, 3H).
    # Query block is pre-scaled by C**-0.5 (matching the PyTorch forward).
    w_qkv = jnp.concatenate(
        [w_query * (C ** -0.5), w_key, w_value], axis=0).T          # (C, 3H)

    return pl.pallas_call(
        attention_head_kernel,
        out_shape=jax.ShapeDtypeStruct((B, T, H), x.dtype),
        in_specs=[
            pl.BlockSpec(memory_space=pltpu.MemorySpace.VMEM),      # x (whole)
            pl.BlockSpec(memory_space=pltpu.MemorySpace.VMEM),      # fused W_qkv
        ],
        out_specs=pl.BlockSpec(memory_space=pltpu.MemorySpace.VMEM),
    )(x, w_qkv)


def reference_attention_head(x, w_key, w_query, w_value):
    """Pure-JAX reference matching the PyTorch forward."""
    B, T, C = x.shape
    k = x @ w_key.T
    q = x @ w_query.T
    v = x @ w_value.T
    wei = (q @ jnp.swapaxes(k, -2, -1)) * (C ** -0.5)
    tril = jnp.tril(jnp.ones((T, T), dtype=jnp.float32))
    wei = jnp.where(tril == 0, -jnp.inf, wei)
    wei = jax.nn.softmax(wei, axis=-1)
    return wei @ v


if __name__ == "__main__":
    key = jax.random.PRNGKey(0)
    kx, kk, kq, kv = jax.random.split(key, 4)

    B, T = 2, BLOCK_SIZE
    x = jax.random.normal(kx, (B, T, N_EMBED), dtype=jnp.float32)

    # Deterministic parameter init (shapes from nn.Linear(N_EMBED, head_size)).
    scale = 1.0 / (N_EMBED ** 0.5)
    w_key = jax.random.uniform(kk, (HEAD_SIZE, N_EMBED), jnp.float32, -scale, scale)
    w_query = jax.random.uniform(kq, (HEAD_SIZE, N_EMBED), jnp.float32, -scale, scale)
    w_value = jax.random.uniform(kv, (HEAD_SIZE, N_EMBED), jnp.float32, -scale, scale)

    out = attention_head(x, w_key, w_query, w_value)
    out = jax.block_until_ready(out)

    ref = reference_attention_head(x, w_key, w_query, w_value)
    assert out.shape == (B, T, HEAD_SIZE), out.shape
    assert jnp.allclose(out, ref, atol=1e-5, rtol=1e-5), "mismatch vs reference"

    print("KERNEL_OK")
</pallas_src>

<mosaic_0001>
module attributes {stable_mosaic.version = 11 : i64} {
  func.func @attention_head_kernel(%arg0: memref<2x8x32xf32, #tpu.memory_space<vmem>>, %arg1: memref<32x48xf32, #tpu.memory_space<vmem>>, %arg2: memref<2x8x16xf32, #tpu.memory_space<vmem>>) attributes {dimension_semantics = [], scalar_prefetch = 0 : i64, scratch_operands = 0 : i64, tpu.core_type = #tpu.core_type<tc>} {
    %c0 = arith.constant 0 : index
    %c0_0 = arith.constant 0 : index
    %c0_1 = arith.constant 0 : index
    %0 = vector.load %arg0[%c0, %c0_0, %c0_1] : memref<2x8x32xf32, #tpu.memory_space<vmem>>, vector<2x8x32xf32>
    %c0_2 = arith.constant 0 : index
    %c0_3 = arith.constant 0 : index
    %1 = vector.load %arg1[%c0_2, %c0_3] : memref<32x48xf32, #tpu.memory_space<vmem>>, vector<32x48xf32>
    %2 = vector.shape_cast %0 : vector<2x8x32xf32> to vector<16x32xf32>
    %cst = arith.constant dense<0.000000e+00> : vector<16x48xf32>
    %3 = tpu.matmul %2, %1, %cst {dimension_numbers = #tpu.dot_dimension_numbers<[1], [0], [0], [1], [0, 0, 1, 1], [], []>} : vector<16x32xf32>, vector<32x48xf32>, vector<16x48xf32> -> vector<16x48xf32>
    %4 = vector.shape_cast %3 : vector<16x48xf32> to vector<2x8x48xf32>
    %5 = vector.extract_strided_slice %4 {offsets = [0, 0, 0], sizes = [2, 8, 16], strides = [1, 1, 1]} : vector<2x8x48xf32> to vector<2x8x16xf32>
    %6 = vector.extract_strided_slice %4 {offsets = [0, 0, 16], sizes = [2, 8, 16], strides = [1, 1, 1]} : vector<2x8x48xf32> to vector<2x8x16xf32>
    %7 = vector.extract_strided_slice %4 {offsets = [0, 0, 32], sizes = [2, 8, 16], strides = [1, 1, 1]} : vector<2x8x48xf32> to vector<2x8x16xf32>
    "tpu.trace_start"() <{level = 10 : i32, message = "bqh,bkh->bqk"}> : () -> ()
    %cst_4 = arith.constant dense<0.000000e+00> : vector<2x8x8xf32>
    %8 = tpu.matmul %5, %6, %cst_4 {dimension_numbers = #tpu.dot_dimension_numbers<[2], [2], [1], [1], [0, 0, 0, 1, 1, 1], [0], [0]>} : vector<2x8x16xf32>, vector<2x8x16xf32>, vector<2x8x8xf32> -> vector<2x8x8xf32>
    "tpu.trace_stop"() : () -> ()
    %9 = tpu.iota {dimensions = array<i32: 0>} : vector<8x8xi32>
    %10 = tpu.iota {dimensions = array<i32: 1>} : vector<8x8xi32>
    %11 = arith.cmpi sge, %9, %10 : vector<8x8xi32>
    %cst_5 = arith.constant -1.000000e+30 : f32
    %12 = vector.shape_cast %11 : vector<8x8xi1> to vector<1x8x8xi1>
    %13 = vector.broadcast %12 : vector<1x8x8xi1> to vector<2x8x8xi1>
    %14 = vector.broadcast %cst_5 : f32 to vector<2x8x8xf32>
    %15 = arith.select %13, %8, %14 : vector<2x8x8xi1>, vector<2x8x8xf32>
    %cst_6 = arith.constant dense<0xFF800000> : vector<2x8xf32>
    %16 = vector.multi_reduction <maximumf>, %15, %cst_6 [2] : vector<2x8x8xf32> to vector<2x8xf32>
    %17 = vector.shape_cast %16 : vector<2x8xf32> to vector<2x8x1xf32>
    %18 = vector.broadcast %17 : vector<2x8x1xf32> to vector<2x8x8xf32>
    %19 = arith.subf %15, %18 : vector<2x8x8xf32>
    %20 = math.exp %19 : vector<2x8x8xf32>
    %cst_7 = arith.constant dense<0.000000e+00> : vector<2x8xf32>
    %21 = vector.multi_reduction <add>, %20, %cst_7 [2] : vector<2x8x8xf32> to vector<2x8xf32>
    %22 = vector.shape_cast %21 : vector<2x8xf32> to vector<2x8x1xf32>
    %23 = vector.broadcast %22 : vector<2x8x1xf32> to vector<2x8x8xf32>
    %24 = arith.divf %20, %23 : vector<2x8x8xf32>
    "tpu.trace_start"() <{level = 10 : i32, message = "bqk,bkh->bqh"}> : () -> ()
    %cst_8 = arith.constant dense<0.000000e+00> : vector<2x8x16xf32>
    %25 = tpu.matmul %24, %7, %cst_8 {dimension_numbers = #tpu.dot_dimension_numbers<[2], [1], [1], [2], [0, 0, 0, 1, 1, 2], [0], [0]>} : vector<2x8x8xf32>, vector<2x8x16xf32>, vector<2x8x16xf32> -> vector<2x8x16xf32>
    "tpu.trace_stop"() : () -> ()
    %c0_9 = arith.constant 0 : index
    %c0_10 = arith.constant 0 : index
    %c0_11 = arith.constant 0 : index
    %26 = vector.load %arg2[%c0_9, %c0_10, %c0_11] : memref<2x8x16xf32, #tpu.memory_space<vmem>>, vector<2x8x16xf32>
    tpu.vector_store %arg2[%c0_9, %c0_10, %c0_11], %25 {strides = array<i32>} : memref<2x8x16xf32, #tpu.memory_space<vmem>>, vector<2x8x16xf32>,
    return
  }
}

</mosaic_0001>

<bundles_post_ra>
// kernel: tpu_custom_call.1
= control target key start
LH: loop header
LB: loop body
LE: loop exit
PB: predicated region body
PF: predicated region fallthrough
CT: control target
= control target key end

     0   :  { %7 = vsyncpa [#allocation3], 0  ;;  %s722_s0 = inlined_call_operand.hbm [shape: f32[2,8,32], index: 0, kind: input, shape index: {}]   ;;  %s723_s1 = inlined_call_operand.hbm [shape: f32[32,48], index: 1, kind: input, shape index: {}]   ;;  %s724_s2 = inlined_call_operand.hbm [shape: f32[2,8,16], index: 2, kind: output, shape index: {}]  }
   0x1   :  { %8 = vsyncpa [#allocation6], 0 }
   0x2   :  { %9 = vsyncpa [#allocation4], 0  ;;  %s637_s9 = smov [#allocation2]   ;;  %s565_s13 = scalar_lea.hbm %s722_s0, 256 }
   0x3   :  { %s15_s10 = sshll.u32 %s637_s9, 4  ;;  %p566_p0 = scmp.ne.s32.totalorder %s722_s0, %s565_s13  ;;  %s16_s10 = int_to_ptr.vmem [resolvable:$true] %s15_s10 }
   0x4   :  { %p569_p1 = scmp.lt.u32.totalorder %s565_s13, %s722_s0 }
   0x6   :  { %p571_p2 = pnand %p569_p1, %p566_p0 }
   0x8   :  { %574 = shalt.err (!%p571_p2)
}
   0x9   :  { %s575_s18 = scalar_lea.vmem %s16_s10, 256  ;;  %p580_p4 = scmp.lt.s32.totalorder %s16_s10, %s16_s10 }
   0xa   :  { %p576_p3 = scmp.ne.s32.totalorder %s16_s10, %s575_s18  ;;  %p581_p5 = scmp.lt.s32.totalorder %s575_s18, %s575_s18 }
   0xc   :  { %p582_p6 = por %p581_p5, %p580_p4 }
   0xe   :  { %p583_p7 = pnand %p582_p6, %p576_p3 }
  0x10   :  { %586 = shalt.err (!%p583_p7)
}
  0x11   :  { %s638_s19 = smov 128   ;;  %s639_s20 = smov 8  }
  0x12   :  { %21 = dma.hbm_to_vmem [thread:$0]  %s722_s0, 256, %s16_s10, [#allocation3], %s638_s19, %s638_s19, %s639_s20  }
  0x13   :  { %s640_s23 = smov [#allocation5]   ;;  %s587_s27 = scalar_lea.hbm %s723_s1, 512 }
  0x14   :  { %s27_s24 = sshll.u32 %s640_s23, 4  ;;  %p588_p8 = scmp.ne.s32.totalorder %s723_s1, %s587_s27  ;;  %s28_s24 = int_to_ptr.vmem [resolvable:$true] %s27_s24 }
  0x15   :  { %p591_p9 = scmp.lt.u32.totalorder %s587_s27, %s723_s1 }
  0x17   :  { %p593_p10 = pnand %p591_p9, %p588_p8 }
  0x19   :  { %596 = shalt.err (!%p593_p10)
}
  0x1a   :  { %s597_s4 = scalar_lea.vmem %s28_s24, 512  ;;  %p602_p12 = scmp.lt.s32.totalorder %s28_s24, %s28_s24 }
  0x1b   :  { %p598_p11 = scmp.ne.s32.totalorder %s28_s24, %s597_s4  ;;  %p603_p13 = scmp.lt.s32.totalorder %s597_s4, %s597_s4 }
  0x1d   :  { %p604_p0 = por %p603_p13, %p602_p12 }
  0x1f   :  { %p605_p1 = pnand %p604_p0, %p598_p11 }
  0x21   :  { %608 = shalt.err (!%p605_p1)
}
  0x22   :  { %33 = dma.hbm_to_vmem [thread:$0]  %s723_s1, 512, %s28_s24, [#allocation6], %s638_s19, %s638_s19, %s639_s20  }
  0x23   :  { %631 = dma.done.wait [#allocation3], 256  }
  0x24   :  { %632 = vsyncadd [#allocation3], 4294967040 }
  0x25   :  { %633 = dma.done.wait [#allocation6], 512  }
  0x26   :  { %634 = vsyncadd [#allocation6], 4294966784  ;;  %vm46_vm0 = vcmask 261120   ;;  %v42_v0 = vld [vmem:[#allocation5] sm:$0xff]  ;;  %v43_v1 = vld [vmem:[#allocation5 + $0x8] sm:$0xff]  ;;  %v641_v8 = vmov 0.0   ;;  %v283_v13 = vlaneseq }
  0x27   :  { %v44_v2 = vld [vmem:[#allocation5 + $0x10] sm:$0xff]  ;;  %v540_v3 = vpack.c.bf16 %v43_v1, %v42_v0  ;;  %v45_v4 = vld [vmem:[#allocation5 + $0x18] sm:$0xff]  ;;  %520 = vmatprep.subr.mxu1 %v641_v8  ;;  %vm642_vm1 = vmmov 0   ;;  %s643_s1 = smov 112   ;;  %vm131_vm2 = vcmask 130048   ;;  %vm292_vm4 = vcmask 64512  }
  0x28   :  { %v40_v5 = vld [vmem:[#allocation2] sm:$0xff]  ;;  %v544_v6 = vpack.c.bf16 %v45_v4, %v44_v2  ;;  %v41_v7 = vld [vmem:[#allocation2 + $0x8] sm:$0xff]  ;;  %522 = vmatprep.mubr.msk.f32.mxu1 %vm642_vm1, %v641_v8  ;;  %v284_v14 = vshrl.u32 %v283_v13, 7  ;;  %v286_v15 = vand.u32 127, %v283_v13  ;;  %s644_s6 = smov 96   ;;  %s645_s7 = smov [#allocation7]  }
  0x29   :  { %517 = vmatprep.mubr.msk.f32.mxu0 %vm46_vm0, %v40_v5  ;;  %541 = vmatprep.subr.bf16.mxu0 %v540_v3  ;;  %s474_s8 = sshll.u32 %s645_s7, 4  ;;  %s475_s8 = int_to_ptr.vmem [resolvable:$true] %s474_s8 }
  0x2a   :  { %543 = vmatpush3.bf16.msra.mxu0 %v540_v3  ;;  %vm287_vm3 = vcmp.ge.s32.totalorder %v284_v14, %v286_v15  ;;  %s609_s9 = scalar_lea.vmem %s475_s8, 256  ;;  %p614_p3 = scmp.lt.s32.totalorder %s475_s8, %s475_s8 }
  0x2b   :  { %545 = vmatprep.subr.bf16.mxu0 %v544_v6  ;;  %p610_p2 = scmp.ne.s32.totalorder %s475_s8, %s609_s9  ;;  %p615_p4 = scmp.lt.s32.totalorder %s609_s9, %s609_s9 }
  0x2d   :  { %p616_p5 = por %p615_p4, %p614_p3 }
  0x2e   :  { %547 = vmatpush3.bf16.msra.mxu0 %v544_v6 }
  0x2f   :  { %530 = vmatprep.subr.mxu0 %v641_v8  ;;  %p617_p6 = pnand %p616_p5, %p610_p2 }
  0x31   :  { %518 = vmatmul.mubr.msk.f32.vlgmr.msra.gmra.mrb[0].mxu0 %vm46_vm0, %v41_v7 }
  0x32   :  { %532 = vmatprep.mubr.msk.f32.mxu0 %vm642_vm1, %v641_v8 }
 0x104   :  { %v519_v9 = vpop.f32.mrb[0].mxu0 }
 0x105   :  { %v119_v10 = vpop.f32.mrb[1].mxu0 }
 0x106   :  { %129 = vrot.lane.b32.xlu0 %v119_v10, %s643_s1 }
 0x10a   :  { %207 = vrot.lane.b32.xlu0 %v519_v9, %s643_s1 }
 0x178   :  { %v130_v11 = vpop.permute.xlu0 %129 }
 0x179   :  { %521 = vmatpush3.xpose.msk.msra.mxu1 %vm131_vm2, %v130_v11 }
 0x17a   :  { %525 = vmatprep.subr.mxu1 %v641_v8 }
 0x17c   :  { %523 = vmatmul.mubr.msk.f32.vlgmr.msra.gmra.mrb[0].mxu1 %vm131_vm2, %v119_v10  ;;  %v208_v12 = vpop.permute.xlu0 %207 }
 0x17d   :  { %526 = vmatpush3.xpose.msk.msra.mxu1 %vm131_vm2, %v208_v12  ;;  %527 = vmatprep.mubr.msk.f32.mxu1 %vm642_vm1, %v641_v8 }
 0x17e   :  { %535 = vmatprep.subr.mxu1 %v641_v8 }
 0x180   :  { %528 = vmatmul.mubr.msk.f32.vlgmr.msra.gmra.mrb[2].mxu1 %vm131_vm2, %v519_v9 }
 0x181   :  { %537 = vmatprep.mubr.msk.f32.mxu1 %vm642_vm1, %v641_v8 }
 0x24f   :  { %v202_v16 = vpop.f32.mrb[0].mxu1 }
 0x250   :  { %v290_v17 = vsel %vm287_vm3, %v202_v16, -1e+30  ;;  %v524_v18 = vpop.f32.mrb[1].mxu1 }
 0x251   :  { %v293_v19 = vsel %vm292_vm4, %v290_v17, -inf }
 0x252   :  { %294 = vmax.xlane.f32.xlu1 %v293_v19 }
 0x253   :  { %v279_v20 = vpop.f32.mrb[2].mxu1 }
 0x254   :  { %v291_v21 = vsel %vm287_vm3, %v279_v20, -1e+30  ;;  %v529_v22 = vpop.f32.mrb[3].mxu1 }
 0x255   :  { %v296_v23 = vsel %vm292_vm4, %v291_v21, -inf }
 0x256   :  { %297 = vmax.xlane.f32.xlu1 %v296_v23 }
 0x267   :  { %315 = vrot.lane.b32.xlu1 %v119_v10, %s644_s6 }
 0x2df   :  { %v295_v24 = vpop.xlane.xlu1 %294 }
 0x2e0   :  { %v299_v25 = vsub.f32 %v290_v17, %v295_v24 }
 0x2e2   :  { %v301_v26 = vmul.f32 1.442695, %v299_v25 }
 0x2e3   :  { %v298_v27 = vpop.xlane.xlu1 %297 }
 0x2e4   :  { %557 = vpow2.f32 %v301_v26  ;;  %v300_v28 = vsub.f32 %v291_v21, %v298_v27 }
 0x2e6   :  { %v303_v29 = vmul.f32 1.442695, %v300_v28 }
 0x2e7   :  { %v316_v30 = vpop.permute.xlu1 %315 }
 0x2e8   :  { %559 = vpow2.f32 %v303_v29  ;;  %531 = vmatpush3.msra.mxu0 %v316_v30 }
 0x2ee   :  { %v558_v31 = vpop.eup %557 }
 0x2ef   :  { %v305_v32 = vsel %vm292_vm4, %v558_v31, 0.0 }
 0x2f0   :  { %306 = vadd.xlane.f32.xlu0 %v305_v32 }
 0x2f2   :  { %v560_v33 = vpop.eup %559 }
 0x2f3   :  { %v308_v34 = vsel %vm292_vm4, %v560_v33, 0.0 }
 0x2f4   :  { %309 = vadd.xlane.f32.xlu1 %v308_v34 }
 0x305   :  { %391 = vrot.lane.b32.xlu1 %v519_v9, %s644_s6 }
 0x37d   :  { %v307_v35 = vpop.xlane.xlu0 %306 }
 0x37e   :  { %561 = vrcp.f32 %v307_v35 }
 0x381   :  { %v310_v36 = vpop.xlane.xlu1 %309 }
 0x382   :  { %563 = vrcp.f32 %v310_v36 }
 0x385   :  { %v392_v37 = vpop.permute.xlu1 %391 }
 0x386   :  { %536 = vmatpush3.msra.mxu1 %v392_v37 }
 0x388   :  { %v562_v38 = vpop.eup %561 }
 0x389   :  { %v312_v39 = vmul.f32 %v562_v38, %v558_v31 }
 0x38b   :  { %533 = vmatmul.mubr.msk.f32.vlgmr.msra.gmra.mrb[2].mxu0 %vm292_vm4, %v312_v39 }
 0x38c   :  { %v564_v40 = vpop.eup %563 }
 0x38d   :  { %v314_v41 = vmul.f32 %v564_v40, %v560_v33 }
 0x38f   :  { %538 = vmatmul.mubr.msk.f32.vlgmr.msra.gmra.mrb[4].mxu1 %vm292_vm4, %v314_v41 }
 0x45e   :  { %v387_v42 = vpop.f32.mrb[2].mxu0 }
 0x45f   :  { %467 = vst.msk [vmem:[#allocation7] sm:$0xff] %vm131_vm2, %v387_v42  ;;  %v534_v43 = vpop.f32.mrb[3].mxu0 }
 0x462   :  { %v463_v44 = vpop.f32.mrb[4].mxu1 }
 0x463   :  { %468 = vst.msk [vmem:[#allocation7 + $0x8] sm:$0xff] %vm131_vm2, %v463_v44  ;;  %v539_v45 = vpop.f32.mrb[5].mxu1 }
 0x464   :  { %620 = shalt.err (!%p617_p6)
}
 0x465   :  { %s621_s12 = scalar_lea.hbm %s724_s2, 256 }
 0x466   :  { %p622_p7 = scmp.ne.s32.totalorder %s724_s2, %s621_s12  ;;  %p625_p8 = scmp.lt.u32.totalorder %s621_s12, %s724_s2 }
 0x468   :  { %p627_p9 = pnand %p625_p8, %p622_p7 }
 0x46a   :  { %630 = shalt.err (!%p627_p9)
}
 0x46b   :  { %480 = dma.vmem_to_hbm [thread:$0]  %s475_s8, 256, %s724_s2, [#allocation4], %s638_s19, %s638_s19, %s639_s20  }
 0x46c   :  { %635 = dma.done.wait [#allocation4], 256  }
 0x46d   :  { %636 = vsyncadd [#allocation4], 4294967040 }
 0x46e   :  { %484 = vsyncpa [#allocation3], 1 }
 0x46f   :  { %485 = vsyncpa [#allocation6], 1 }
 0x470   :  { %486 = vsyncpa [#allocation4], 1 }

</bundles_post_ra>
